<compile_context>
chip_gen: v7x
topology: tpu7x:2x2x1
jax: 0.10.0
libtpu: 0.0.40
codegen_flags: <defaults>
</compile_context>

<pallas_src>
import functools

import jax
import jax.numpy as jnp
from jax.experimental import pallas as pl
from jax.experimental.pallas import tpu as pltpu


def _round_up(n, m):
    return (n + m - 1) // m * m


def pack_params(params, compute_dtype=jnp.bfloat16):
    """Fold the dueling head into one matmul and pack every weight/bias into a
    single lane-dense (128-wide) row-stacked slab (one HBM->VMEM DMA).

    Returns (slab, meta); meta holds static row offsets / dims for the kernel.
    """
    w1, b1 = params["w1"], params["b1"]
    w2, b2 = params["w2"], params["b2"]
    # Exact algebraic fold (done in f32 BEFORE any bf16 cast).
    wq = params["wV"] + params["wA"] - jnp.mean(params["wA"], axis=1, keepdims=True)
    bq = params["bV"] + params["bA"] - jnp.mean(params["bA"], axis=1, keepdims=True)

    state_dim, hidden_dim = w1.shape
    action_dim = wq.shape[1]
    # Lane-dense width: multiple of 128 (v5e-friendly; also fine on v6e/v7x).
    lane = _round_up(max(hidden_dim, action_dim), 128)

    def seg(a, rows):
        r, c = a.shape
        return jnp.pad(a.astype(jnp.float32), ((0, rows - r), (0, lane - c)))

    # w2 / wq rows are padded to `lane` because h1 / h2 are lane-wide (the
    # padded rows/cols are zero, so results are bit-for-bit what an unpadded
    # contraction would give).  All segment offsets stay 8-row aligned.
    segments = [
        seg(w1, _round_up(state_dim, 8)),
        seg(b1, 8),
        seg(w2, lane),
        seg(b2, 8),
        seg(wq, lane),
        seg(bq, 8),
    ]
    offsets, row = [], 0
    for s in segments:
        offsets.append(row)
        row += s.shape[0]
    slab = jnp.concatenate(segments, axis=0).astype(compute_dtype)

    meta = dict(
        state_dim=int(state_dim),
        hidden_dim=int(hidden_dim),
        action_dim=int(action_dim),
        lane=int(lane),
        off_w1=offsets[0], off_b1=offsets[1],
        off_w2=offsets[2], off_b2=offsets[3],
        off_wq=offsets[4], off_bq=offsets[5],
    )
    return slab, meta


def _mlp_duel_kernel(x_ref, p_ref, q_ref, *, meta):
    S = meta["state_dim"]
    L = meta["lane"]
    cdt = p_ref.dtype          # MXU operand dtype (bf16 by default, or f32)
    f32 = jnp.float32

    # Static, tile-aligned views into the packed slab (zero runtime cost).
    w1 = p_ref[meta["off_w1"]:meta["off_w1"] + S, :]
    b1 = p_ref[meta["off_b1"]:meta["off_b1"] + 1, :].astype(f32)
    w2 = p_ref[meta["off_w2"]:meta["off_w2"] + L, :]
    b2 = p_ref[meta["off_b2"]:meta["off_b2"] + 1, :].astype(f32)
    wq = p_ref[meta["off_wq"]:meta["off_wq"] + L, :]
    bq = p_ref[meta["off_bq"]:meta["off_bq"] + 1, :].astype(f32)

    x = x_ref[...].astype(cdt)

    # fc1 + relu   (f32 accumulation; element-wise stays f32 -> OK on v5e VPU)
    h1 = jnp.dot(x, w1, preferred_element_type=f32) + b1
    h1 = jnp.maximum(h1, 0.0)

    # fc2 + relu
    h2 = jnp.dot(h1.astype(cdt), w2, preferred_element_type=f32) + b2
    h2 = jnp.maximum(h2, 0.0)

    # Folded dueling head: one lane-dense matmul replaces V-dot, A-dot,
    # mean and combine.  Padded output columns are exactly zero.
    q = jnp.dot(h2.astype(cdt), wq, preferred_element_type=f32) + bq
    q_ref[...] = q.astype(q_ref.dtype)


def mlp_duel_forward(x, slab, meta, *, tile_b=512):
    """x: (B, state_dim); slab/meta from pack_params. Returns (B, action_dim) Q."""
    B, S = x.shape
    assert S == meta["state_dim"]
    A, L = meta["action_dim"], meta["lane"]

    # Adaptive batch tiling: >=2 (even) grid steps once B exceeds one tile so
    # both v7x TensorCores get work, and pad only to n*tb.
    n = max(1, pl.cdiv(B, tile_b))
    if n > 1 and n % 2:
        n += 1
    tb = _round_up(pl.cdiv(B, n), 8)
    b_pad = n * tb

    x = x.astype(slab.dtype)               # bf16 operands -> half the x DMA bytes
    if b_pad != B:
        x = jnp.pad(x, ((0, b_pad - B), (0, 0)))

    kernel = functools.partial(_mlp_duel_kernel, meta=meta)

    # Explicit scoped-VMEM budget: params (1-2 buffers) + double-buffered x /
    # out tiles + f32 intermediates, with headroom.  Capped at 64 MiB so the
    # same budget is valid on v7x (64 MiB physical) as well as v5e/v6e.
    def _vmem_limit(slab_buffers):
        need = (slab_buffers * slab.size * slab.dtype.itemsize
                + 2 * tb * S * x.dtype.itemsize     # x tiles (double-buffered)
                + 2 * tb * L * 4                    # f32 out tiles
                + 4 * tb * L * 4)                   # h1/h2/q f32 temporaries
        return int(min(max(2 * need, 8 << 20), 64 << 20))

    def _call(slab_spec, slab_buffers):
        return pl.pallas_call(
            kernel,
            out_shape=jax.ShapeDtypeStruct((b_pad, L), jnp.float32),
            grid_spec=pltpu.PrefetchScalarGridSpec(
                num_scalar_prefetch=0,
                grid=(n,),
                in_specs=[
                    pl.BlockSpec((tb, S), lambda i: (i, 0)),   # batch tile of x
                    slab_spec,                                 # VMEM-resident params
                ],
                # Lane-dense output block -> full-lane vst, no masked stores.
                out_specs=pl.BlockSpec((tb, L), lambda i: (i, 0)),
            ),
            compiler_params=pltpu.CompilerParams(
                dimension_semantics=("parallel",),   # independent batch tiles
                vmem_limit_bytes=_vmem_limit(slab_buffers),
            ),
        )(x, slab)

    try:
        # Constant index_map -> a single VMEM buffer suffices; halves param
        # VMEM (matters at production widths, esp. under v7x's 64 MiB VMEM).
        q = _call(pl.BlockSpec(slab.shape, lambda i: (0, 0),
                               pipeline_mode=pl.Buffered(1)), 1)
    except Exception:
        # Fallback for jax versions without BlockSpec pipeline_mode support:
        # default double-buffered constant operand (still only DMA'd once).
        q = _call(pl.BlockSpec(slab.shape, lambda i: (0, 0)), 2)

    return q[:B, :A]


def init_params(key, state_dim, action_dim, hidden_dim):
    """Deterministic init mimicking nn.Linear's uniform(-1/sqrt(fan_in), +...)."""
    def linear(key, fan_in, fan_out):
        kw, kb = jax.random.split(key)
        bound = 1.0 / jnp.sqrt(fan_in)
        w = jax.random.uniform(kw, (fan_in, fan_out), jnp.float32, -bound, bound)
        b = jax.random.uniform(kb, (1, fan_out), jnp.float32, -bound, bound)
        return w, b

    k1, k2, k3, k4 = jax.random.split(key, 4)
    w1, b1 = linear(k1, state_dim, hidden_dim)
    w2, b2 = linear(k2, hidden_dim, hidden_dim)
    wV, bV = linear(k3, hidden_dim, action_dim)
    wA, bA = linear(k4, hidden_dim, action_dim)
    return {"w1": w1, "b1": b1, "w2": w2, "b2": b2,
            "wV": wV, "bV": bV, "wA": wA, "bA": bA}


def reference_forward(x, p):
    """Pure-JAX reference matching the PyTorch module's (unfused) semantics."""
    h1 = jnp.maximum(x @ p["w1"] + p["b1"], 0.0)
    h2 = jnp.maximum(h1 @ p["w2"] + p["b2"], 0.0)
    v = h2 @ p["wV"] + p["bV"]
    adv = h2 @ p["wA"] + p["bA"]
    return v + adv - jnp.mean(adv, axis=1, keepdims=True)


if __name__ == "__main__":
    batch, state_dim, action_dim, hidden_dim = 8, 16, 4, 32

    key = jax.random.PRNGKey(0)
    kx, kp = jax.random.split(key)
    x = jax.random.normal(kx, (batch, state_dim), jnp.float32)
    params = init_params(kp, state_dim, action_dim, hidden_dim)
    q_ref = reference_forward(x, params)

    # 1) Exact-semantics check: f32-packed slab vs unfused f32 reference
    #    (the algebraic fold only reorders f32 rounding).
    slab32, meta32 = pack_params(params, compute_dtype=jnp.float32)
    q32 = jax.block_until_ready(mlp_duel_forward(x, slab32, meta32))
    assert q32.shape == (batch, action_dim)
    assert jnp.allclose(q32, q_ref, atol=1e-4, rtol=1e-4), "f32 mismatch vs reference"

    # 2) Default performance path: bf16 MXU operands, f32 accumulation
    #    (tolerance loosened for bf16 quantization of weights/activations).
    slab16, meta16 = pack_params(params)            # compute_dtype=bf16 default
    q16 = jax.block_until_ready(mlp_duel_forward(x, slab16, meta16))
    assert q16.shape == (batch, action_dim)
    assert jnp.allclose(q16, q_ref, atol=5e-2, rtol=5e-2), "bf16 mismatch vs reference"

    print("KERNEL_OK")
</pallas_src>

<mosaic_0001>
module attributes {stable_mosaic.version = 11 : i64} {
  func.func @_mlp_duel_kernel(%arg0: i32, %arg1: memref<8x16xf32, #tpu.memory_space<vmem>>, %arg2: memref<296x128xf32, #tpu.memory_space<vmem>>, %arg3: memref<8x128xf32, #tpu.memory_space<vmem>>) attributes {dimension_semantics = [#tpu.dimension_semantics<parallel>], iteration_bounds = array<i64: 1>, scalar_prefetch = 0 : i64, scratch_operands = 0 : i64, tpu.core_type = #tpu.core_type<tc>, window_params = [{transform_indices = @transform_0, window_bounds = array<i64: 8, 16>}, {pipeline_mode = #tpu.pipeline_mode<synchronous>, transform_indices = @transform_1, window_bounds = array<i64: 296, 128>}, {transform_indices = @transform_2, window_bounds = array<i64: 8, 128>}]} {
    %c0 = arith.constant 0 : index
    %c0_0 = arith.constant 0 : index
    %0 = vector.load %arg2[%c0, %c0_0] : memref<296x128xf32, #tpu.memory_space<vmem>>, vector<16x128xf32>
    %c16 = arith.constant 16 : index
    %c0_1 = arith.constant 0 : index
    %1 = vector.load %arg2[%c16, %c0_1] : memref<296x128xf32, #tpu.memory_space<vmem>>, vector<1x128xf32>
    %c24 = arith.constant 24 : index
    %c0_2 = arith.constant 0 : index
    %2 = vector.load %arg2[%c24, %c0_2] : memref<296x128xf32, #tpu.memory_space<vmem>>, vector<128x128xf32>
    %c152 = arith.constant 152 : index
    %c0_3 = arith.constant 0 : index
    %3 = vector.load %arg2[%c152, %c0_3] : memref<296x128xf32, #tpu.memory_space<vmem>>, vector<1x128xf32>
    %c160 = arith.constant 160 : index
    %c0_4 = arith.constant 0 : index
    %4 = vector.load %arg2[%c160, %c0_4] : memref<296x128xf32, #tpu.memory_space<vmem>>, vector<128x128xf32>
    %c288 = arith.constant 288 : index
    %c0_5 = arith.constant 0 : index
    %5 = vector.load %arg2[%c288, %c0_5] : memref<296x128xf32, #tpu.memory_space<vmem>>, vector<1x128xf32>
    %c0_6 = arith.constant 0 : index
    %c0_7 = arith.constant 0 : index
    %6 = vector.load %arg1[%c0_6, %c0_7] : memref<8x16xf32, #tpu.memory_space<vmem>>, vector<8x16xf32>
    %cst = arith.constant dense<0.000000e+00> : vector<8x128xf32>
    %7 = tpu.matmul %6, %0, %cst {dimension_numbers = #tpu.dot_dimension_numbers<[1], [0], [0], [1], [0, 0, 1, 1], [], []>} : vector<8x16xf32>, vector<16x128xf32>, vector<8x128xf32> -> vector<8x128xf32>
    %8 = vector.broadcast %1 : vector<1x128xf32> to vector<8x128xf32>
    %9 = arith.addf %7, %8 : vector<8x128xf32>
    %cst_8 = arith.constant 0.000000e+00 : f32
    %10 = vector.broadcast %cst_8 : f32 to vector<8x128xf32>
    %11 = arith.maximumf %9, %10 : vector<8x128xf32>
    %cst_9 = arith.constant dense<0.000000e+00> : vector<8x128xf32>
    %12 = tpu.matmul %11, %2, %cst_9 {dimension_numbers = #tpu.dot_dimension_numbers<[1], [0], [0], [1], [0, 0, 1, 1], [], []>} : vector<8x128xf32>, vector<128x128xf32>, vector<8x128xf32> -> vector<8x128xf32>
    %13 = vector.broadcast %3 : vector<1x128xf32> to vector<8x128xf32>
    %14 = arith.addf %12, %13 : vector<8x128xf32>
    %cst_10 = arith.constant 0.000000e+00 : f32
    %15 = vector.broadcast %cst_10 : f32 to vector<8x128xf32>
    %16 = arith.maximumf %14, %15 : vector<8x128xf32>
    %cst_11 = arith.constant dense<0.000000e+00> : vector<8x128xf32>
    %17 = tpu.matmul %16, %4, %cst_11 {dimension_numbers = #tpu.dot_dimension_numbers<[1], [0], [0], [1], [0, 0, 1, 1], [], []>} : vector<8x128xf32>, vector<128x128xf32>, vector<8x128xf32> -> vector<8x128xf32>
    %18 = vector.broadcast %5 : vector<1x128xf32> to vector<8x128xf32>
    %19 = arith.addf %17, %18 : vector<8x128xf32>
    %c0_12 = arith.constant 0 : index
    %c0_13 = arith.constant 0 : index
    %20 = vector.load %arg3[%c0_12, %c0_13] : memref<8x128xf32, #tpu.memory_space<vmem>>, vector<8x128xf32>
    tpu.vector_store %arg3[%c0_12, %c0_13], %19 {strides = array<i32>} : memref<8x128xf32, #tpu.memory_space<vmem>>, vector<8x128xf32>,
    return
  }
  func.func @transform_0(%arg0: i32) -> (i32, i32) {
    %c0_i32 = arith.constant 0 : i32
    %c0_i32_0 = arith.constant 0 : i32
    return %arg0, %c0_i32 : i32, i32
  }
  func.func @transform_1(%arg0: i32) -> (i32, i32) {
    %c0_i32 = arith.constant 0 : i32
    %c0_i32_0 = arith.constant 0 : i32
    %c0_i32_1 = arith.constant 0 : i32
    return %c0_i32, %c0_i32_0 : i32, i32
  }
  func.func @transform_2(%arg0: i32) -> (i32, i32) {
    %c0_i32 = arith.constant 0 : i32
    %c0_i32_0 = arith.constant 0 : i32
    return %arg0, %c0_i32 : i32, i32
  }
}

module attributes {stable_mosaic.version = 11 : i64} {
  func.func @_mlp_duel_kernel(%arg0: i32, %arg1: memref<8x16xf32, #tpu.memory_space<vmem>>, %arg2: memref<296x128xf32, #tpu.memory_space<vmem>>, %arg3: memref<8x128xf32, #tpu.memory_space<vmem>>) attributes {dimension_semantics = [#tpu.dimension_semantics<parallel>], iteration_bounds = array<i64: 1>, scalar_prefetch = 0 : i64, scratch_operands = 0 : i64, tpu.core_type = #tpu.core_type<tc>, window_params = [{transform_indices = @transform_0, window_bounds = array<i64: 8, 16>}, {pipeline_mode = #tpu.pipeline_mode<synchronous>, transform_indices = @transform_1, window_bounds = array<i64: 296, 128>}, {transform_indices = @transform_2, window_bounds = array<i64: 8, 128>}]} {
    %c0 = arith.constant 0 : index
    %c0_0 = arith.constant 0 : index
    %0 = vector.load %arg2[%c0, %c0_0] : memref<296x128xf32, #tpu.memory_space<vmem>>, vector<16x128xf32>
    %c16 = arith.constant 16 : index
    %c0_1 = arith.constant 0 : index
    %1 = vector.load %arg2[%c16, %c0_1] : memref<296x128xf32, #tpu.memory_space<vmem>>, vector<1x128xf32>
    %c24 = arith.constant 24 : index
    %c0_2 = arith.constant 0 : index
    %2 = vector.load %arg2[%c24, %c0_2] : memref<296x128xf32, #tpu.memory_space<vmem>>, vector<128x128xf32>
    %c152 = arith.constant 152 : index
    %c0_3 = arith.constant 0 : index
    %3 = vector.load %arg2[%c152, %c0_3] : memref<296x128xf32, #tpu.memory_space<vmem>>, vector<1x128xf32>
    %c160 = arith.constant 160 : index
    %c0_4 = arith.constant 0 : index
    %4 = vector.load %arg2[%c160, %c0_4] : memref<296x128xf32, #tpu.memory_space<vmem>>, vector<128x128xf32>
    %c288 = arith.constant 288 : index
    %c0_5 = arith.constant 0 : index
    %5 = vector.load %arg2[%c288, %c0_5] : memref<296x128xf32, #tpu.memory_space<vmem>>, vector<1x128xf32>
    %c0_6 = arith.constant 0 : index
    %c0_7 = arith.constant 0 : index
    %6 = vector.load %arg1[%c0_6, %c0_7] : memref<8x16xf32, #tpu.memory_space<vmem>>, vector<8x16xf32>
    %cst = arith.constant dense<0.000000e+00> : vector<8x128xf32>
    %7 = tpu.matmul %6, %0, %cst {dimension_numbers = #tpu.dot_dimension_numbers<[1], [0], [0], [1], [0, 0, 1, 1], [], []>} : vector<8x16xf32>, vector<16x128xf32>, vector<8x128xf32> -> vector<8x128xf32>
    %8 = vector.broadcast %1 : vector<1x128xf32> to vector<8x128xf32>
    %9 = arith.addf %7, %8 : vector<8x128xf32>
    %cst_8 = arith.constant 0.000000e+00 : f32
    %10 = vector.broadcast %cst_8 : f32 to vector<8x128xf32>
    %11 = arith.maximumf %9, %10 : vector<8x128xf32>
    %cst_9 = arith.constant dense<0.000000e+00> : vector<8x128xf32>
    %12 = tpu.matmul %11, %2, %cst_9 {dimension_numbers = #tpu.dot_dimension_numbers<[1], [0], [0], [1], [0, 0, 1, 1], [], []>} : vector<8x128xf32>, vector<128x128xf32>, vector<8x128xf32> -> vector<8x128xf32>
    %13 = vector.broadcast %3 : vector<1x128xf32> to vector<8x128xf32>
    %14 = arith.addf %12, %13 : vector<8x128xf32>
    %cst_10 = arith.constant 0.000000e+00 : f32
    %15 = vector.broadcast %cst_10 : f32 to vector<8x128xf32>
    %16 = arith.maximumf %14, %15 : vector<8x128xf32>
    %cst_11 = arith.constant dense<0.000000e+00> : vector<8x128xf32>
    %17 = tpu.matmul %16, %4, %cst_11 {dimension_numbers = #tpu.dot_dimension_numbers<[1], [0], [0], [1], [0, 0, 1, 1], [], []>} : vector<8x128xf32>, vector<128x128xf32>, vector<8x128xf32> -> vector<8x128xf32>
    %18 = vector.broadcast %5 : vector<1x128xf32> to vector<8x128xf32>
    %19 = arith.addf %17, %18 : vector<8x128xf32>
    %c0_12 = arith.constant 0 : index
    %c0_13 = arith.constant 0 : index
    %20 = vector.load %arg3[%c0_12, %c0_13] : memref<8x128xf32, #tpu.memory_space<vmem>>, vector<8x128xf32>
    tpu.vector_store %arg3[%c0_12, %c0_13], %19 {strides = array<i32>} : memref<8x128xf32, #tpu.memory_space<vmem>>, vector<8x128xf32>,
    return
  }
  func.func @transform_0(%arg0: i32) -> (i32, i32) {
    %c0_i32 = arith.constant 0 : i32
    %c0_i32_0 = arith.constant 0 : i32
    return %arg0, %c0_i32 : i32, i32
  }
  func.func @transform_1(%arg0: i32) -> (i32, i32) {
    %c0_i32 = arith.constant 0 : i32
    %c0_i32_0 = arith.constant 0 : i32
    %c0_i32_1 = arith.constant 0 : i32
    return %c0_i32, %c0_i32_0 : i32, i32
  }
  func.func @transform_2(%arg0: i32) -> (i32, i32) {
    %c0_i32 = arith.constant 0 : i32
    %c0_i32_0 = arith.constant 0 : i32
    return %arg0, %c0_i32 : i32, i32
  }
}

</mosaic_0001>

<bundles_post_ra>
// kernel: tpu_custom_call.1
= control target key start
LH: loop header
LB: loop body
LE: loop exit
PB: predicated region body
PF: predicated region fallthrough
CT: control target
= control target key end

     0   :  { %7 = vsyncpa [#allocation3], 0  ;;  %s656_s0 = inlined_call_operand.hbm [shape: f32[8,16], index: 0, kind: input, shape index: {}]   ;;  %s657_s1 = inlined_call_operand.hbm [shape: f32[296,128], index: 1, kind: input, shape index: {}]   ;;  %s658_s2 = inlined_call_operand.hbm [shape: f32[8,128], index: 2, kind: output, shape index: {}]  }
   0x1   :  { %8 = vsyncpa [#allocation6], 0 }
   0x2   :  { %9 = vsyncpa [#allocation4], 0  ;;  %s570_s9 = smov [#allocation2]   ;;  %s571_s11 = smov [#allocation5]  }
   0x3   :  { %s16_s10 = sshll.u32 %s570_s9, 4  ;;  %s25_s12 = sshll.u32 %s571_s11, 4  ;;  %s17_s10 = int_to_ptr.vmem [resolvable:$true] %s16_s10  ;;  %s593_s12 = int_to_ptr.vmem [resolvable:$true] %s25_s12 }
   0x4   :  { %s498_s15 = scalar_lea.hbm %s656_s0, 128 }
   0x5   :  { %p499_p0 = scmp.ne.s32.totalorder %s656_s0, %s498_s15  ;;  %p502_p1 = scmp.lt.u32.totalorder %s498_s15, %s656_s0 }
   0x7   :  { %p504_p2 = pnand %p502_p1, %p499_p0 }
   0x9   :  { %507 = shalt.err (!%p504_p2)
}
   0xa   :  { %s508_s20 = scalar_lea.vmem %s17_s10, 128  ;;  %p513_p4 = scmp.lt.s32.totalorder %s17_s10, %s17_s10 }
   0xb   :  { %p509_p3 = scmp.ne.s32.totalorder %s17_s10, %s508_s20  ;;  %p514_p5 = scmp.lt.s32.totalorder %s508_s20, %s508_s20 }
   0xd   :  { %p515_p6 = por %p514_p5, %p513_p4 }
   0xf   :  { %p516_p7 = pnand %p515_p6, %p509_p3 }
  0x11   :  { %519 = shalt.err (!%p516_p7)
}
  0x12   :  { %19 = dma.hbm_to_vmem [thread:$0]  %s656_s0, 128, %s17_s10, [#allocation3]  }
  0x13   :  { %s520_s25 = scalar_lea.hbm %s657_s1, 4736 }
  0x14   :  { %p521_p8 = scmp.ne.s32.totalorder %s657_s1, %s520_s25  ;;  %p524_p9 = scmp.lt.u32.totalorder %s520_s25, %s657_s1 }
  0x16   :  { %p526_p10 = pnand %p524_p9, %p521_p8 }
  0x18   :  { %529 = shalt.err (!%p526_p10)
}
  0x19   :  { %s530_s30 = scalar_lea.vmem %s593_s12, 4736  ;;  %p535_p12 = scmp.lt.s32.totalorder %s593_s12, %s593_s12 }
  0x1a   :  { %p531_p11 = scmp.ne.s32.totalorder %s593_s12, %s530_s30  ;;  %p536_p13 = scmp.lt.s32.totalorder %s530_s30, %s530_s30 }
  0x1c   :  { %p537_p0 = por %p536_p13, %p535_p12 }
  0x1e   :  { %p538_p1 = pnand %p537_p0, %p531_p11 }
  0x20   :  { %541 = shalt.err (!%p538_p1)
}
  0x21   :  { %s572_s0 = smov 128   ;;  %s573_s3 = smov 8  }
  0x22   :  { %31 = dma.hbm_to_vmem [thread:$0]  %s657_s1, 4736, %s593_s12, [#allocation6], %s572_s0, %s572_s0, %s573_s3  }
  0x23   :  { %564 = dma.done.wait [#allocation3], 128  }
  0x24   :  { %565 = vsyncadd [#allocation3], 4294967168 }
  0x25   :  { %566 = dma.done.wait [#allocation6], 4736  }
  0x26   :  { %567 = vsyncadd [#allocation6], 4294962560  ;;  %v574_v0 = vmov 0.0|0.0   ;;  %vm575_vm0 = vmmov 0   ;;  %v576_v1 = vmov 0.0   ;;  %v38_v2 = vld [vmem:[#allocation5] sm:$0xff] }
  0x27   :  { %439 = vmatprep.subr.bf16.mxu0 %v574_v0  ;;  %366 = vmatprep.mubr.msk.f32.mxu0 %vm575_vm0, %v576_v1  ;;  %v39_v3 = vld [vmem:[#allocation5 + $0x8] sm:$0xff]  ;;  %v41_v5 = vld [vmem:[#allocation5 + $0x18] sm:$0xff]  ;;  %v42_v6 = vld [vmem:[#allocation5 + $0x20] sm:$0xff]  ;;  %vm80_vm1 = vcmask 130048   ;;  %s577_s1 = smov [#allocation7]  }
  0x28   :  { %442 = vmatprep.subr.bf16.mxu1 %v574_v0  ;;  %401 = vmatprep.mubr.msk.f32.mxu1 %vm575_vm0, %v576_v1  ;;  %v440_v4 = vpack.c.bf16 %v39_v3, %v38_v2  ;;  %v43_v7 = vld [vmem:[#allocation5 + $0x28] sm:$0xff]  ;;  %v443_v8 = vpack.c.bf16 %v42_v6, %v41_v5  ;;  %v44_v9 = vld [vmem:[#allocation5 + $0x30] sm:$0xff]  ;;  %v75_v10 = vld [vmem:[#allocation2] sm:$0xff]  ;;  %s311_s6 = sshll.u32 %s577_s1, 4  ;;  %s312_s6 = int_to_ptr.vmem [resolvable:$true] %s311_s6 }
  0x29   :  { %v446_v11 = vpack.c.bf16 %v44_v9, %v43_v7  ;;  %v45_v12 = vld [vmem:[#allocation5 + $0x38] sm:$0xff]  ;;  %v46_v13 = vld [vmem:[#allocation5 + $0x40] sm:$0xff]  ;;  %v47_v15 = vld [vmem:[#allocation5 + $0x48] sm:$0xff]  ;;  %s542_s7 = scalar_lea.vmem %s312_s6, 128  ;;  %p547_p3 = scmp.lt.s32.totalorder %s312_s6, %s312_s6 }
  0x2a   :  { %441 = vmatpush3.bf16.msra.mxu0 %v440_v4  ;;  %444 = vmatpush3.bf16.msra.mxu1 %v443_v8  ;;  %v449_v14 = vpack.c.bf16 %v46_v13, %v45_v12  ;;  %v48_v16 = vld [vmem:[#allocation5 + $0x50] sm:$0xff]  ;;  %v49_v18 = vld [vmem:[#allocation5 + $0x58] sm:$0xff]  ;;  %v50_v19 = vld [vmem:[#allocation5 + $0x60] sm:$0xff]  ;;  %p543_p2 = scmp.ne.s32.totalorder %s312_s6, %s542_s7  ;;  %p548_p4 = scmp.lt.s32.totalorder %s542_s7, %s542_s7 }
  0x2b   :  { %466 = vmatprep.subr.bf16.mxu0 %v574_v0  ;;  %445 = vmatprep.subr.bf16.mxu1 %v574_v0  ;;  %v452_v17 = vpack.c.bf16 %v48_v16, %v47_v15  ;;  %v455_v20 = vpack.c.bf16 %v50_v19, %v49_v18  ;;  %v51_v21 = vld [vmem:[#allocation5 + $0x68] sm:$0xff]  ;;  %v52_v22 = vld [vmem:[#allocation5 + $0x70] sm:$0xff]  ;;  %v53_v24 = vld [vmem:[#allocation5 + $0x78] sm:$0xff] }
  0x2c   :  { %v458_v23 = vpack.c.bf16 %v52_v22, %v51_v21  ;;  %v54_v25 = vld [vmem:[#allocation5 + $0x80] sm:$0xff]  ;;  %v55_v27 = vld [vmem:[#allocation5 + $0x88] sm:$0xff]  ;;  %v56_v28 = vld [vmem:[#allocation5 + $0x90] sm:$0xff]  ;;  %p549_p5 = por %p548_p4, %p547_p3 }
  0x2d   :  { %367 = vmatmul.mubr.msk.f32.vlgmr.msra.gmra.mrb[0].mxu0 %vm80_vm1, %v75_v10  ;;  %v461_v26 = vpack.c.bf16 %v54_v25, %v53_v24  ;;  %v464_v29 = vpack.c.bf16 %v56_v28, %v55_v27  ;;  %v58_v30 = vld [vmem:[#allocation5 + $0xa0] sm:$0xff]  ;;  %v59_v31 = vld [vmem:[#allocation5 + $0xa8] sm:$0xff]  ;;  %v60_v32 = vld [vmem:[#allocation5 + $0xb0] sm:$0xff] }
  0x2e   :  { %436 = vmatprep.mubr.msk.f32.mxu0 %vm575_vm0, %v576_v1  ;;  %447 = vmatpush3.bf16.msra.mxu1 %v446_v11  ;;  %v467_v33 = vpack.c.bf16 %v59_v31, %v58_v30  ;;  %v61_v34 = vld [vmem:[#allocation5 + $0xb8] sm:$0xff]  ;;  %v62_v36 = vld [vmem:[#allocation5 + $0xc0] sm:$0xff]  ;;  %v63_v37 = vld [vmem:[#allocation5 + $0xc8] sm:$0xff]  ;;  %p550_p6 = pnand %p549_p5, %p543_p2 }
  0x2f   :  { %448 = vmatprep.subr.bf16.mxu1 %v574_v0  ;;  %v470_v35 = vpack.c.bf16 %v61_v34, %v60_v32  ;;  %v473_v38 = vpack.c.bf16 %v63_v37, %v62_v36  ;;  %v64_v39 = vld [vmem:[#allocation5 + $0xd0] sm:$0xff]  ;;  %v65_v40 = vld [vmem:[#allocation5 + $0xd8] sm:$0xff]  ;;  %v66_v42 = vld [vmem:[#allocation5 + $0xe0] sm:$0xff] }
  0x30   :  { %468 = vmatpush3.bf16.msra.mxu0 %v467_v33  ;;  %v476_v41 = vpack.c.bf16 %v65_v40, %v64_v39  ;;  %v67_v43 = vld [vmem:[#allocation5 + $0xe8] sm:$0xff]  ;;  %v68_v45 = vld [vmem:[#allocation5 + $0xf0] sm:$0xff]  ;;  %v69_v46 = vld [vmem:[#allocation5 + $0xf8] sm:$0xff] }
  0x31   :  { %469 = vmatprep.subr.bf16.mxu0 %v574_v0  ;;  %v479_v44 = vpack.c.bf16 %v67_v43, %v66_v42  ;;  %v482_v47 = vpack.c.bf16 %v69_v46, %v68_v45  ;;  %v70_v48 = vld [vmem:[#allocation5 + $0x100] sm:$0xff]  ;;  %v71_v49 = vld [vmem:[#allocation5 + $0x108] sm:$0xff]  ;;  %v321_v51 = vld [vmem:[#allocation5 + $0x10] ss:$0 sm:$0xff] }
  0x32   :  { %450 = vmatpush3.bf16.msra.mxu1 %v449_v14  ;;  %v485_v50 = vpack.c.bf16 %v71_v49, %v70_v48  ;;  %v72_v56 = vld [vmem:[#allocation5 + $0x110] sm:$0xff]  ;;  %v73_v57 = vld [vmem:[#allocation5 + $0x118] sm:$0xff]  ;;  %v324_v1 = vld [vmem:[#allocation5 + $0x120] ss:$0 sm:$0xff] }
  0x33   :  { %451 = vmatprep.subr.bf16.mxu1 %v574_v0  ;;  %v488_v58 = vpack.c.bf16 %v73_v57, %v72_v56  ;;  %v323_v59 = vld [vmem:[#allocation5 + $0x98] ss:$0 sm:$0xff] }
  0x34   :  { %471 = vmatpush3.bf16.msra.mxu0 %v470_v35 }
  0x35   :  { %472 = vmatprep.subr.bf16.mxu0 %v574_v0 }
  0x36   :  { %453 = vmatpush3.bf16.msra.mxu1 %v452_v17 }
  0x37   :  { %454 = vmatprep.subr.bf16.mxu1 %v574_v0 }
  0x38   :  { %474 = vmatpush3.bf16.msra.mxu0 %v473_v38 }
  0x39   :  { %475 = vmatprep.subr.bf16.mxu0 %v574_v0 }
  0x3a   :  { %456 = vmatpush3.bf16.msra.mxu1 %v455_v20 }
  0x3b   :  { %457 = vmatprep.subr.bf16.mxu1 %v574_v0 }
  0x3c   :  { %477 = vmatpush3.bf16.msra.mxu0 %v476_v41 }
  0x3d   :  { %478 = vmatprep.subr.bf16.mxu0 %v574_v0 }
  0x3e   :  { %459 = vmatpush3.bf16.msra.mxu1 %v458_v23 }
  0x3f   :  { %460 = vmatprep.subr.bf16.mxu1 %v574_v0 }
  0x40   :  { %480 = vmatpush3.bf16.msra.mxu0 %v479_v44 }
  0x41   :  { %481 = vmatprep.subr.bf16.mxu0 %v574_v0 }
  0x42   :  { %462 = vmatpush3.bf16.msra.mxu1 %v461_v26 }
  0x43   :  { %463 = vmatprep.subr.bf16.mxu1 %v574_v0 }
  0x44   :  { %483 = vmatpush3.bf16.msra.mxu0 %v482_v47 }
  0x45   :  { %484 = vmatprep.subr.bf16.mxu0 %v574_v0 }
  0x46   :  { %465 = vmatpush3.bf16.msra.mxu1 %v464_v29 }
  0x48   :  { %486 = vmatpush3.bf16.msra.mxu0 %v485_v50 }
  0x49   :  { %487 = vmatprep.subr.bf16.mxu0 %v574_v0 }
  0x4c   :  { %489 = vmatpush3.bf16.msra.mxu0 %v488_v58 }
 0x100   :  { %v150_v52 = vpop.f32.mrb[0].mxu0 }
 0x101   :  { %v151_v53 = vadd.f32 %v321_v51, %v150_v52  ;;  %v368_v54 = vpop.f32.mrb[1].mxu0 }
 0x103   :  { %v154_v55 = vmax.f32 %v151_v53, 0.0 }
 0x105   :  { %402 = vmatmul.mubr.f32.vlgmr.msra.gmra.mrb[0].mxu1 %v154_v55 }
 0x1d8   :  { %v225_v60 = vpop.f32.mrb[0].mxu1 }
 0x1d9   :  { %v226_v61 = vadd.f32 %v323_v59, %v225_v60  ;;  %v403_v62 = vpop.f32.mrb[1].mxu1 }
 0x1db   :  { %v229_v63 = vmax.f32 %v226_v61, 0.0 }
 0x1dd   :  { %437 = vmatmul.mubr.f32.vlgmr.msra.gmra.mrb[2].mxu0 %v229_v63 }
 0x2b0   :  { %v300_v0 = vpop.f32.mrb[2].mxu0 }
 0x2b1   :  { %v301_v2 = vadd.f32 %v324_v1, %v300_v0  ;;  %v438_v3 = vpop.f32.mrb[3].mxu0 }
 0x2b3   :  { %304 = vst [vmem:[#allocation7] sm:$0xff] %v301_v2 }
 0x2b4   :  { %553 = shalt.err (!%p550_p6)
}
 0x2b5   :  { %s554_s10 = scalar_lea.hbm %s658_s2, 128 }
 0x2b6   :  { %p555_p7 = scmp.ne.s32.totalorder %s658_s2, %s554_s10  ;;  %p558_p8 = scmp.lt.u32.totalorder %s554_s10, %s658_s2 }
 0x2b8   :  { %p560_p9 = pnand %p558_p8, %p555_p7 }
 0x2ba   :  { %563 = shalt.err (!%p560_p9)
}
 0x2bb   :  { %314 = dma.vmem_to_hbm [thread:$0]  %s312_s6, 128, %s658_s2, [#allocation4]  }
 0x2bc   :  { %568 = dma.done.wait [#allocation4], 128  }
 0x2bd   :  { %569 = vsyncadd [#allocation4], 4294967168 }
 0x2be   :  { %318 = vsyncpa [#allocation3], 1 }
 0x2bf   :  { %319 = vsyncpa [#allocation6], 1 }
 0x2c0   :  { %320 = vsyncpa [#allocation4], 1 }

// kernel: tpu_custom_call.1
= control target key start
LH: loop header
LB: loop body
LE: loop exit
PB: predicated region body
PF: predicated region fallthrough
CT: control target
= control target key end

     0   :  { %7 = vsyncpa [#allocation3], 0  ;;  %s656_s0 = inlined_call_operand.hbm [shape: f32[8,16], index: 0, kind: input, shape index: {}]   ;;  %s657_s1 = inlined_call_operand.hbm [shape: f32[296,128], index: 1, kind: input, shape index: {}]   ;;  %s658_s2 = inlined_call_operand.hbm [shape: f32[8,128], index: 2, kind: output, shape index: {}]  }
   0x1   :  { %8 = vsyncpa [#allocation6], 0 }
   0x2   :  { %9 = vsyncpa [#allocation4], 0  ;;  %s570_s9 = smov [#allocation2]   ;;  %s571_s11 = smov [#allocation5]  }
   0x3   :  { %s16_s10 = sshll.u32 %s570_s9, 4  ;;  %s25_s12 = sshll.u32 %s571_s11, 4  ;;  %s17_s10 = int_to_ptr.vmem [resolvable:$true] %s16_s10  ;;  %s593_s12 = int_to_ptr.vmem [resolvable:$true] %s25_s12 }
   0x4   :  { %s498_s15 = scalar_lea.hbm %s656_s0, 128 }
   0x5   :  { %p499_p0 = scmp.ne.s32.totalorder %s656_s0, %s498_s15  ;;  %p502_p1 = scmp.lt.u32.totalorder %s498_s15, %s656_s0 }
   0x7   :  { %p504_p2 = pnand %p502_p1, %p499_p0 }
   0x9   :  { %507 = shalt.err (!%p504_p2)
}
   0xa   :  { %s508_s20 = scalar_lea.vmem %s17_s10, 128  ;;  %p513_p4 = scmp.lt.s32.totalorder %s17_s10, %s17_s10 }
   0xb   :  { %p509_p3 = scmp.ne.s32.totalorder %s17_s10, %s508_s20  ;;  %p514_p5 = scmp.lt.s32.totalorder %s508_s20, %s508_s20 }
   0xd   :  { %p515_p6 = por %p514_p5, %p513_p4 }
   0xf   :  { %p516_p7 = pnand %p515_p6, %p509_p3 }
  0x11   :  { %519 = shalt.err (!%p516_p7)
}
  0x12   :  { %19 = dma.hbm_to_vmem [thread:$0]  %s656_s0, 128, %s17_s10, [#allocation3]  }
  0x13   :  { %s520_s25 = scalar_lea.hbm %s657_s1, 4736 }
  0x14   :  { %p521_p8 = scmp.ne.s32.totalorder %s657_s1, %s520_s25  ;;  %p524_p9 = scmp.lt.u32.totalorder %s520_s25, %s657_s1 }
  0x16   :  { %p526_p10 = pnand %p524_p9, %p521_p8 }
  0x18   :  { %529 = shalt.err (!%p526_p10)
}
  0x19   :  { %s530_s30 = scalar_lea.vmem %s593_s12, 4736  ;;  %p535_p12 = scmp.lt.s32.totalorder %s593_s12, %s593_s12 }
  0x1a   :  { %p531_p11 = scmp.ne.s32.totalorder %s593_s12, %s530_s30  ;;  %p536_p13 = scmp.lt.s32.totalorder %s530_s30, %s530_s30 }
  0x1c   :  { %p537_p0 = por %p536_p13, %p535_p12 }
  0x1e   :  { %p538_p1 = pnand %p537_p0, %p531_p11 }
  0x20   :  { %541 = shalt.err (!%p538_p1)
}
  0x21   :  { %s572_s0 = smov 128   ;;  %s573_s3 = smov 8  }
  0x22   :  { %31 = dma.hbm_to_vmem [thread:$0]  %s657_s1, 4736, %s593_s12, [#allocation6], %s572_s0, %s572_s0, %s573_s3  }
  0x23   :  { %564 = dma.done.wait [#allocation3], 128  }
  0x24   :  { %565 = vsyncadd [#allocation3], 4294967168 }
  0x25   :  { %566 = dma.done.wait [#allocation6], 4736  }
  0x26   :  { %567 = vsyncadd [#allocation6], 4294962560  ;;  %v574_v0 = vmov 0.0|0.0   ;;  %vm575_vm0 = vmmov 0   ;;  %v576_v1 = vmov 0.0   ;;  %v38_v2 = vld [vmem:[#allocation5] sm:$0xff] }
  0x27   :  { %439 = vmatprep.subr.bf16.mxu0 %v574_v0  ;;  %366 = vmatprep.mubr.msk.f32.mxu0 %vm575_vm0, %v576_v1  ;;  %v39_v3 = vld [vmem:[#allocation5 + $0x8] sm:$0xff]  ;;  %v41_v5 = vld [vmem:[#allocation5 + $0x18] sm:$0xff]  ;;  %v42_v6 = vld [vmem:[#allocation5 + $0x20] sm:$0xff]  ;;  %vm80_vm1 = vcmask 130048   ;;  %s577_s1 = smov [#allocation7]  }
  0x28   :  { %442 = vmatprep.subr.bf16.mxu1 %v574_v0  ;;  %401 = vmatprep.mubr.msk.f32.mxu1 %vm575_vm0, %v576_v1  ;;  %v440_v4 = vpack.c.bf16 %v39_v3, %v38_v2  ;;  %v43_v7 = vld [vmem:[#allocation5 + $0x28] sm:$0xff]  ;;  %v443_v8 = vpack.c.bf16 %v42_v6, %v41_v5  ;;  %v44_v9 = vld [vmem:[#allocation5 + $0x30] sm:$0xff]  ;;  %v75_v10 = vld [vmem:[#allocation2] sm:$0xff]  ;;  %s311_s6 = sshll.u32 %s577_s1, 4  ;;  %s312_s6 = int_to_ptr.vmem [resolvable:$true] %s311_s6 }
  0x29   :  { %v446_v11 = vpack.c.bf16 %v44_v9, %v43_v7  ;;  %v45_v12 = vld [vmem:[#allocation5 + $0x38] sm:$0xff]  ;;  %v46_v13 = vld [vmem:[#allocation5 + $0x40] sm:$0xff]  ;;  %v47_v15 = vld [vmem:[#allocation5 + $0x48] sm:$0xff]  ;;  %s542_s7 = scalar_lea.vmem %s312_s6, 128  ;;  %p547_p3 = scmp.lt.s32.totalorder %s312_s6, %s312_s6 }
  0x2a   :  { %441 = vmatpush3.bf16.msra.mxu0 %v440_v4  ;;  %444 = vmatpush3.bf16.msra.mxu1 %v443_v8  ;;  %v449_v14 = vpack.c.bf16 %v46_v13, %v45_v12  ;;  %v48_v16 = vld [vmem:[#allocation5 + $0x50] sm:$0xff]  ;;  %v49_v18 = vld [vmem:[#allocation5 + $0x58] sm:$0xff]  ;;  %v50_v19 = vld [vmem:[#allocation5 + $0x60] sm:$0xff]  ;;  %p543_p2 = scmp.ne.s32.totalorder %s312_s6, %s542_s7  ;;  %p548_p4 = scmp.lt.s32.totalorder %s542_s7, %s542_s7 }
  0x2b   :  { %466 = vmatprep.subr.bf16.mxu0 %v574_v0  ;;  %445 = vmatprep.subr.bf16.mxu1 %v574_v0  ;;  %v452_v17 = vpack.c.bf16 %v48_v16, %v47_v15  ;;  %v455_v20 = vpack.c.bf16 %v50_v19, %v49_v18  ;;  %v51_v21 = vld [vmem:[#allocation5 + $0x68] sm:$0xff]  ;;  %v52_v22 = vld [vmem:[#allocation5 + $0x70] sm:$0xff]  ;;  %v53_v24 = vld [vmem:[#allocation5 + $0x78] sm:$0xff] }
  0x2c   :  { %v458_v23 = vpack.c.bf16 %v52_v22, %v51_v21  ;;  %v54_v25 = vld [vmem:[#allocation5 + $0x80] sm:$0xff]  ;;  %v55_v27 = vld [vmem:[#allocation5 + $0x88] sm:$0xff]  ;;  %v56_v28 = vld [vmem:[#allocation5 + $0x90] sm:$0xff]  ;;  %p549_p5 = por %p548_p4, %p547_p3 }
  0x2d   :  { %367 = vmatmul.mubr.msk.f32.vlgmr.msra.gmra.mrb[0].mxu0 %vm80_vm1, %v75_v10  ;;  %v461_v26 = vpack.c.bf16 %v54_v25, %v53_v24  ;;  %v464_v29 = vpack.c.bf16 %v56_v28, %v55_v27  ;;  %v58_v30 = vld [vmem:[#allocation5 + $0xa0] sm:$0xff]  ;;  %v59_v31 = vld [vmem:[#allocation5 + $0xa8] sm:$0xff]  ;;  %v60_v32 = vld [vmem:[#allocation5 + $0xb0] sm:$0xff] }
  0x2e   :  { %436 = vmatprep.mubr.msk.f32.mxu0 %vm575_vm0, %v576_v1  ;;  %447 = vmatpush3.bf16.msra.mxu1 %v446_v11  ;;  %v467_v33 = vpack.c.bf16 %v59_v31, %v58_v30  ;;  %v61_v34 = vld [vmem:[#allocation5 + $0xb8] sm:$0xff]  ;;  %v62_v36 = vld [vmem:[#allocation5 + $0xc0] sm:$0xff]  ;;  %v63_v37 = vld [vmem:[#allocation5 + $0xc8] sm:$0xff]  ;;  %p550_p6 = pnand %p549_p5, %p543_p2 }
  0x2f   :  { %448 = vmatprep.subr.bf16.mxu1 %v574_v0  ;;  %v470_v35 = vpack.c.bf16 %v61_v34, %v60_v32  ;;  %v473_v38 = vpack.c.bf16 %v63_v37, %v62_v36  ;;  %v64_v39 = vld [vmem:[#allocation5 + $0xd0] sm:$0xff]  ;;  %v65_v40 = vld [vmem:[#allocation5 + $0xd8] sm:$0xff]  ;;  %v66_v42 = vld [vmem:[#allocation5 + $0xe0] sm:$0xff] }
  0x30   :  { %468 = vmatpush3.bf16.msra.mxu0 %v467_v33  ;;  %v476_v41 = vpack.c.bf16 %v65_v40, %v64_v39  ;;  %v67_v43 = vld [vmem:[#allocation5 + $0xe8] sm:$0xff]  ;;  %v68_v45 = vld [vmem:[#allocation5 + $0xf0] sm:$0xff]  ;;  %v69_v46 = vld [vmem:[#allocation5 + $0xf8] sm:$0xff] }
  0x31   :  { %469 = vmatprep.subr.bf16.mxu0 %v574_v0  ;;  %v479_v44 = vpack.c.bf16 %v67_v43, %v66_v42  ;;  %v482_v47 = vpack.c.bf16 %v69_v46, %v68_v45  ;;  %v70_v48 = vld [vmem:[#allocation5 + $0x100] sm:$0xff]  ;;  %v71_v49 = vld [vmem:[#allocation5 + $0x108] sm:$0xff]  ;;  %v321_v51 = vld [vmem:[#allocation5 + $0x10] ss:$0 sm:$0xff] }
  0x32   :  { %450 = vmatpush3.bf16.msra.mxu1 %v449_v14  ;;  %v485_v50 = vpack.c.bf16 %v71_v49, %v70_v48  ;;  %v72_v56 = vld [vmem:[#allocation5 + $0x110] sm:$0xff]  ;;  %v73_v57 = vld [vmem:[#allocation5 + $0x118] sm:$0xff]  ;;  %v324_v1 = vld [vmem:[#allocation5 + $0x120] ss:$0 sm:$0xff] }
  0x33   :  { %451 = vmatprep.subr.bf16.mxu1 %v574_v0  ;;  %v488_v58 = vpack.c.bf16 %v73_v57, %v72_v56  ;;  %v323_v59 = vld [vmem:[#allocation5 + $0x98] ss:$0 sm:$0xff] }
  0x34   :  { %471 = vmatpush3.bf16.msra.mxu0 %v470_v35 }
  0x35   :  { %472 = vmatprep.subr.bf16.mxu0 %v574_v0 }
  0x36   :  { %453 = vmatpush3.bf16.msra.mxu1 %v452_v17 }
  0x37   :  { %454 = vmatprep.subr.bf16.mxu1 %v574_v0 }
  0x38   :  { %474 = vmatpush3.bf16.msra.mxu0 %v473_v38 }
  0x39   :  { %475 = vmatprep.subr.bf16.mxu0 %v574_v0 }
  0x3a   :  { %456 = vmatpush3.bf16.msra.mxu1 %v455_v20 }
  0x3b   :  { %457 = vmatprep.subr.bf16.mxu1 %v574_v0 }
  0x3c   :  { %477 = vmatpush3.bf16.msra.mxu0 %v476_v41 }
  0x3d   :  { %478 = vmatprep.subr.bf16.mxu0 %v574_v0 }
  0x3e   :  { %459 = vmatpush3.bf16.msra.mxu1 %v458_v23 }
  0x3f   :  { %460 = vmatprep.subr.bf16.mxu1 %v574_v0 }
  0x40   :  { %480 = vmatpush3.bf16.msra.mxu0 %v479_v44 }
  0x41   :  { %481 = vmatprep.subr.bf16.mxu0 %v574_v0 }
  0x42   :  { %462 = vmatpush3.bf16.msra.mxu1 %v461_v26 }
  0x43   :  { %463 = vmatprep.subr.bf16.mxu1 %v574_v0 }
  0x44   :  { %483 = vmatpush3.bf16.msra.mxu0 %v482_v47 }
  0x45   :  { %484 = vmatprep.subr.bf16.mxu0 %v574_v0 }
  0x46   :  { %465 = vmatpush3.bf16.msra.mxu1 %v464_v29 }
  0x48   :  { %486 = vmatpush3.bf16.msra.mxu0 %v485_v50 }
  0x49   :  { %487 = vmatprep.subr.bf16.mxu0 %v574_v0 }
  0x4c   :  { %489 = vmatpush3.bf16.msra.mxu0 %v488_v58 }
 0x100   :  { %v150_v52 = vpop.f32.mrb[0].mxu0 }
 0x101   :  { %v151_v53 = vadd.f32 %v321_v51, %v150_v52  ;;  %v368_v54 = vpop.f32.mrb[1].mxu0 }
 0x103   :  { %v154_v55 = vmax.f32 %v151_v53, 0.0 }
 0x105   :  { %402 = vmatmul.mubr.f32.vlgmr.msra.gmra.mrb[0].mxu1 %v154_v55 }
 0x1d8   :  { %v225_v60 = vpop.f32.mrb[0].mxu1 }
 0x1d9   :  { %v226_v61 = vadd.f32 %v323_v59, %v225_v60  ;;  %v403_v62 = vpop.f32.mrb[1].mxu1 }
 0x1db   :  { %v229_v63 = vmax.f32 %v226_v61, 0.0 }
 0x1dd   :  { %437 = vmatmul.mubr.f32.vlgmr.msra.gmra.mrb[2].mxu0 %v229_v63 }
 0x2b0   :  { %v300_v0 = vpop.f32.mrb[2].mxu0 }
 0x2b1   :  { %v301_v2 = vadd.f32 %v324_v1, %v300_v0  ;;  %v438_v3 = vpop.f32.mrb[3].mxu0 }
 0x2b3   :  { %304 = vst [vmem:[#allocation7] sm:$0xff] %v301_v2 }
 0x2b4   :  { %553 = shalt.err (!%p550_p6)
}
 0x2b5   :  { %s554_s10 = scalar_lea.hbm %s658_s2, 128 }
 0x2b6   :  { %p555_p7 = scmp.ne.s32.totalorder %s658_s2, %s554_s10  ;;  %p558_p8 = scmp.lt.u32.totalorder %s554_s10, %s658_s2 }
 0x2b8   :  { %p560_p9 = pnand %p558_p8, %p555_p7 }
 0x2ba   :  { %563 = shalt.err (!%p560_p9)
}
 0x2bb   :  { %314 = dma.vmem_to_hbm [thread:$0]  %s312_s6, 128, %s658_s2, [#allocation4]  }
 0x2bc   :  { %568 = dma.done.wait [#allocation4], 128  }
 0x2bd   :  { %569 = vsyncadd [#allocation4], 4294967168 }
 0x2be   :  { %318 = vsyncpa [#allocation3], 1 }
 0x2bf   :  { %319 = vsyncpa [#allocation6], 1 }
 0x2c0   :  { %320 = vsyncpa [#allocation4], 1 }

</bundles_post_ra>
